<compile_context>
chip_gen: v6e
topology: v6e:2x2x1
jax: 0.10.0
libtpu: 0.0.40
codegen_flags: <defaults>
</compile_context>

<pallas_src>
import jax
import jax.numpy as jnp
from jax.experimental import pallas as pl
from jax.experimental.pallas import tpu as pltpu


# ---------------------------------------------------------------------------
# Kernel
# ---------------------------------------------------------------------------
def hypernet_kernel(sow_ref, w1_ref, wgx_ref, wgh_ref, h0_ref, w2_ref, b2_ref,
                    out_ref):
    f32 = jnp.float32
    H = h0_ref.shape[-1]

    # fc1 + ReLU.  Column H of w1 is a constant-1 pass-through (relu(1) == 1)
    # that carries the fused GRU gate biases into the next matmul.
    x_aug = jnp.maximum(
        jnp.dot(sow_ref[...], w1_ref[...], preferred_element_type=f32), 0.0)   # (1, H+1)

    h = h0_ref[...]                                                             # (1, H)

    # GRU gate pre-activations, both sides summed into one (1, 4H) row:
    #   cols 0:H    r   = Wir x + b_ir + Whr h + b_hr
    #   cols H:2H   z   = Wiz x + b_iz + Whz h + b_hz
    #   cols 2H:3H  n_x = Win x + b_in
    #   cols 3H:4H  n_h = Whn h + b_hn
    g = (jnp.dot(x_aug, wgx_ref[...], preferred_element_type=f32) +
         jnp.dot(h,     wgh_ref[...], preferred_element_type=f32))

    r = jax.nn.sigmoid(g[:, 0 * H:1 * H])
    z = jax.nn.sigmoid(g[:, 1 * H:2 * H])
    n = jnp.tanh(g[:, 2 * H:3 * H] + r * g[:, 3 * H:4 * H])
    h_new = (1.0 - z) * n + z * h

    # Fused lane-dense output: cols 0:H <- h_new (identity block of w2_fused),
    # cols H:H+out <- fc2(h_new).  Single unmasked 128-lane store.
    out_ref[...] = jnp.dot(h_new, w2_ref[...],
                           preferred_element_type=f32) + b2_ref[...]


# ---------------------------------------------------------------------------
# Host-side parameter packing
# ---------------------------------------------------------------------------
def pack_params(params):
    """Packs the 'natural' per-matrix params into 5 kernel weight operands."""
    f32 = jnp.float32
    D = params["w1"].shape[0]
    H = params["w1"].shape[1]
    out_sz = params["w2"].shape[1]
    # lane-dense output slab width (multiple of 128)
    slab = -(-(H + out_sz) // 128) * 128

    # fc1 augmented weight (D+1, H+1):
    #   rows 0:D, cols 0:H = fc1 weight ; row D, cols 0:H = fc1 bias
    #   col H: zeros except row D = 1  -> constant-1 output column after ReLU.
    w1_aug = jnp.zeros((D + 1, H + 1), f32)
    w1_aug = w1_aug.at[:D, :H].set(params["w1"])
    w1_aug = w1_aug.at[D, :H].set(params["b1"][0])
    w1_aug = w1_aug.at[D, H].set(1.0)

    # GRU x-side gate weights (H+1, 4H); last row carries ALL gate biases.
    zH = jnp.zeros((H, H), f32)
    wgx = jnp.concatenate([params["wir"], params["wiz"], params["win"], zH], axis=1)
    bias_row = jnp.concatenate([params["bir"] + params["bhr"],
                                params["biz"] + params["bhz"],
                                params["bin"], params["bhn"]], axis=1)      # (1, 4H)
    wgx = jnp.concatenate([wgx, bias_row], axis=0)                          # (H+1, 4H)

    # GRU h-side gate weights (H, 4H).
    wgh = jnp.concatenate([params["whr"], params["whz"], zH, params["whn"]], axis=1)

    # fc2 fused with an identity copy of h_new, zero-padded to `slab` lanes.
    w2_fused = jnp.zeros((H, slab), f32)
    w2_fused = w2_fused.at[:, :H].set(jnp.eye(H, dtype=f32))
    w2_fused = w2_fused.at[:, H:H + out_sz].set(params["w2"])
    b2_fused = jnp.zeros((1, slab), f32)
    b2_fused = b2_fused.at[:, H:H + out_sz].set(params["b2"])

    return dict(w1_aug=w1_aug, wgx=wgx, wgh=wgh,
                w2_fused=w2_fused, b2_fused=b2_fused,
                D=D, H=H, out=out_sz, slab=slab)


# ---------------------------------------------------------------------------
# Forward wrapper (one HyperNetwork.forward step)
# ---------------------------------------------------------------------------
def hypernet_forward(sow, packed, h0):
    """Returns (output_vec, new_hidden)."""
    if sow.ndim == 0:                        # mirrors `if SoW.dim() == 0: unsqueeze(0)`
        sow = sow[None]
    # augmented SoW row: [sow, 1] so the fc1 bias (and the constant-1 column)
    # ride in the fc1 matmul.
    sow2 = jnp.concatenate([sow.reshape(1, -1).astype(jnp.float32),
                            jnp.ones((1, 1), jnp.float32)], axis=1)

    H, out_sz, slab = packed["H"], packed["out"], packed["slab"]

    vmem = pl.BlockSpec(memory_space=pltpu.MemorySpace.VMEM)
    inputs = (sow2, packed["w1_aug"], packed["wgx"], packed["wgh"], h0,
              packed["w2_fused"], packed["b2_fused"])

    d_aug = sow2.shape[1]
    flops = 2 * (d_aug * (H + 1) + (H + 1) * 4 * H + H * 4 * H + H * slab)
    bytes_accessed = 4 * (sum(int(a.size) for a in inputs) + slab)

    slab_out = pl.pallas_call(
        hypernet_kernel,
        out_shape=jax.ShapeDtypeStruct((1, slab), jnp.float32),
        in_specs=[vmem] * len(inputs),
        out_specs=vmem,
        compiler_params=pltpu.CompilerParams(vmem_limit_bytes=2 * 1024 * 1024),
        cost_estimate=pl.CostEstimate(flops=flops, transcendentals=3 * H,
                                      bytes_accessed=bytes_accessed),
    )(*inputs)

    h_new = slab_out[:, :H]                   # updated self.hgru (1, H)
    out = slab_out[0, H:H + out_sz]           # torch.squeeze(x, 0)
    return out, h_new

    # TODO(synk): if the caller steps the GRU over T timesteps or batches many
    # hypernetworks, grid over T / batch rows with resident weights to amortize
    # the weight DMA; the module's forward() is a single 1-row step, kept as-is.


# ---------------------------------------------------------------------------
# Init mimicking the module's __init__ (kaiming/xavier uniform, zero biases).
# Weights stored as (in, out).
# ---------------------------------------------------------------------------
def init_params(key, input_size, hidden_size, output_size):
    H = hidden_size
    k1, k2, k3, k4 = jax.random.split(key, 4)

    def uni(k, shape, bound):
        return jax.random.uniform(k, shape, jnp.float32, -bound, bound)

    w1 = uni(k1, (input_size, H), (6.0 / input_size) ** 0.5)   # kaiming (relu)
    b1 = jnp.zeros((1, H), jnp.float32)

    xav = (6.0 / (H + 3 * H)) ** 0.5                           # xavier on (3H, H)
    wih = uni(k2, (H, 3 * H), xav)
    whh = uni(k3, (H, 3 * H), xav)
    wir, wiz, win = wih[:, :H], wih[:, H:2 * H], wih[:, 2 * H:]
    whr, whz, whn = whh[:, :H], whh[:, H:2 * H], whh[:, 2 * H:]
    zh = jnp.zeros((1, H), jnp.float32)                        # GRU biases fill_(0)

    w2 = uni(k4, (H, output_size), (6.0 / H) ** 0.5)           # kaiming (relu)
    b2 = jnp.zeros((1, output_size), jnp.float32)

    return dict(w1=w1, b1=b1,
                wir=wir, wiz=wiz, win=win, bir=zh, biz=zh, bin=zh,
                whr=whr, whz=whz, whn=whn, bhr=zh, bhz=zh, bhn=zh,
                w2=w2, b2=b2)


def hypernet_reference(sow, params, h0):
    """Pure-JAX reference of the same forward pass (correctness check)."""
    x = jnp.maximum(sow.reshape(1, -1) @ params["w1"] + params["b1"], 0.0)
    h = h0
    r = jax.nn.sigmoid(x @ params["wir"] + params["bir"] + h @ params["whr"] + params["bhr"])
    z = jax.nn.sigmoid(x @ params["wiz"] + params["biz"] + h @ params["whz"] + params["bhz"])
    n = jnp.tanh(x @ params["win"] + params["bin"] + r * (h @ params["whn"] + params["bhn"]))
    h_new = (1.0 - z) * n + z * h
    out = h_new @ params["w2"] + params["b2"]
    return out[0], h_new


if __name__ == "__main__":
    # Module-consistent small sizes:
    #   hnet_input_size = 8, output_size = 64, hnet_hidden_size_scale = 2 -> hidden = 32
    input_size, hidden_size, output_size = 8, 32, 64

    key = jax.random.PRNGKey(0)
    pkey, skey = jax.random.split(key)
    params = init_params(pkey, input_size, hidden_size, output_size)
    packed = pack_params(params)

    sow = jax.random.normal(skey, (input_size,), jnp.float32)
    h0 = jnp.zeros((1, hidden_size), jnp.float32)   # init_hidden(): zeros (1,1,H) -> (1,H)

    out, h_new = hypernet_forward(sow, packed, h0)
    jax.block_until_ready((out, h_new))

    ref_out, ref_h = hypernet_reference(sow, params, h0)
    assert out.shape == (output_size,)
    assert h_new.shape == (1, hidden_size)
    assert jnp.allclose(out, ref_out, atol=1e-5, rtol=1e-5)
    assert jnp.allclose(h_new, ref_h, atol=1e-5, rtol=1e-5)

    # Second step feeding the updated hidden state back (stateful GRU usage).
    out2, h_new2 = hypernet_forward(sow, packed, h_new)
    jax.block_until_ready((out2, h_new2))
    ref_out2, ref_h2 = hypernet_reference(sow, params, ref_h)
    assert jnp.allclose(out2, ref_out2, atol=1e-5, rtol=1e-5)
    assert jnp.allclose(h_new2, ref_h2, atol=1e-5, rtol=1e-5)

    print("KERNEL_OK")
</pallas_src>

<mosaic_0001>
module attributes {stable_mosaic.version = 11 : i64} {
  func.func @hypernet_kernel(%arg0: memref<1x9xf32, #tpu.memory_space<vmem>>, %arg1: memref<9x33xf32, #tpu.memory_space<vmem>>, %arg2: memref<33x128xf32, #tpu.memory_space<vmem>>, %arg3: memref<32x128xf32, #tpu.memory_space<vmem>>, %arg4: memref<1x32xf32, #tpu.memory_space<vmem>>, %arg5: memref<32x128xf32, #tpu.memory_space<vmem>>, %arg6: memref<1x128xf32, #tpu.memory_space<vmem>>, %arg7: memref<1x128xf32, #tpu.memory_space<vmem>>) attributes {dimension_semantics = [], scalar_prefetch = 0 : i64, scratch_operands = 0 : i64, tpu.core_type = #tpu.core_type<tc>} {
    %c0 = arith.constant 0 : index
    %c0_0 = arith.constant 0 : index
    %0 = vector.load %arg0[%c0, %c0_0] : memref<1x9xf32, #tpu.memory_space<vmem>>, vector<1x9xf32>
    %c0_1 = arith.constant 0 : index
    %c0_2 = arith.constant 0 : index
    %1 = vector.load %arg1[%c0_1, %c0_2] : memref<9x33xf32, #tpu.memory_space<vmem>>, vector<9x33xf32>
    %cst = arith.constant dense<0.000000e+00> : vector<1x33xf32>
    %2 = tpu.matmul %0, %1, %cst {dimension_numbers = #tpu.dot_dimension_numbers<[1], [0], [0], [1], [0, 0, 1, 1], [], []>} : vector<1x9xf32>, vector<9x33xf32>, vector<1x33xf32> -> vector<1x33xf32>
    %cst_3 = arith.constant 0.000000e+00 : f32
    %3 = vector.broadcast %cst_3 : f32 to vector<1x33xf32>
    %4 = arith.maximumf %2, %3 : vector<1x33xf32>
    %c0_4 = arith.constant 0 : index
    %c0_5 = arith.constant 0 : index
    %5 = vector.load %arg4[%c0_4, %c0_5] : memref<1x32xf32, #tpu.memory_space<vmem>>, vector<1x32xf32>
    %c0_6 = arith.constant 0 : index
    %c0_7 = arith.constant 0 : index
    %6 = vector.load %arg2[%c0_6, %c0_7] : memref<33x128xf32, #tpu.memory_space<vmem>>, vector<33x128xf32>
    %cst_8 = arith.constant dense<0.000000e+00> : vector<1x128xf32>
    %7 = tpu.matmul %4, %6, %cst_8 {dimension_numbers = #tpu.dot_dimension_numbers<[1], [0], [0], [1], [0, 0, 1, 1], [], []>} : vector<1x33xf32>, vector<33x128xf32>, vector<1x128xf32> -> vector<1x128xf32>
    %c0_9 = arith.constant 0 : index
    %c0_10 = arith.constant 0 : index
    %8 = vector.load %arg3[%c0_9, %c0_10] : memref<32x128xf32, #tpu.memory_space<vmem>>, vector<32x128xf32>
    %cst_11 = arith.constant dense<0.000000e+00> : vector<1x128xf32>
    %9 = tpu.matmul %5, %8, %cst_11 {dimension_numbers = #tpu.dot_dimension_numbers<[1], [0], [0], [1], [0, 0, 1, 1], [], []>} : vector<1x32xf32>, vector<32x128xf32>, vector<1x128xf32> -> vector<1x128xf32>
    %10 = arith.addf %7, %9 : vector<1x128xf32>
    %11 = vector.extract_strided_slice %10 {offsets = [0, 0], sizes = [1, 32], strides = [1, 1]} : vector<1x128xf32> to vector<1x32xf32>
    %12 = arith.negf %11 : vector<1x32xf32>
    %13 = math.exp %12 : vector<1x32xf32>
    %cst_12 = arith.constant 1.000000e+00 : f32
    %14 = vector.broadcast %cst_12 : f32 to vector<1x32xf32>
    %15 = arith.addf %14, %13 : vector<1x32xf32>
    %16 = arith.divf %14, %15 : vector<1x32xf32>
    %17 = vector.extract_strided_slice %10 {offsets = [0, 32], sizes = [1, 32], strides = [1, 1]} : vector<1x128xf32> to vector<1x32xf32>
    %18 = arith.negf %17 : vector<1x32xf32>
    %19 = math.exp %18 : vector<1x32xf32>
    %cst_13 = arith.constant 1.000000e+00 : f32
    %20 = vector.broadcast %cst_13 : f32 to vector<1x32xf32>
    %21 = arith.addf %20, %19 : vector<1x32xf32>
    %22 = arith.divf %20, %21 : vector<1x32xf32>
    %23 = vector.extract_strided_slice %10 {offsets = [0, 64], sizes = [1, 32], strides = [1, 1]} : vector<1x128xf32> to vector<1x32xf32>
    %24 = vector.extract_strided_slice %10 {offsets = [0, 96], sizes = [1, 32], strides = [1, 1]} : vector<1x128xf32> to vector<1x32xf32>
    %25 = arith.mulf %16, %24 : vector<1x32xf32>
    %26 = arith.addf %23, %25 : vector<1x32xf32>
    %27 = math.tanh %26 : vector<1x32xf32>
    %cst_14 = arith.constant 1.000000e+00 : f32
    %28 = vector.broadcast %cst_14 : f32 to vector<1x32xf32>
    %29 = arith.subf %28, %22 : vector<1x32xf32>
    %30 = arith.mulf %29, %27 : vector<1x32xf32>
    %31 = arith.mulf %22, %5 : vector<1x32xf32>
    %32 = arith.addf %30, %31 : vector<1x32xf32>
    %c0_15 = arith.constant 0 : index
    %c0_16 = arith.constant 0 : index
    %33 = vector.load %arg5[%c0_15, %c0_16] : memref<32x128xf32, #tpu.memory_space<vmem>>, vector<32x128xf32>
    %cst_17 = arith.constant dense<0.000000e+00> : vector<1x128xf32>
    %34 = tpu.matmul %32, %33, %cst_17 {dimension_numbers = #tpu.dot_dimension_numbers<[1], [0], [0], [1], [0, 0, 1, 1], [], []>} : vector<1x32xf32>, vector<32x128xf32>, vector<1x128xf32> -> vector<1x128xf32>
    %c0_18 = arith.constant 0 : index
    %c0_19 = arith.constant 0 : index
    %35 = vector.load %arg6[%c0_18, %c0_19] : memref<1x128xf32, #tpu.memory_space<vmem>>, vector<1x128xf32>
    %36 = arith.addf %34, %35 : vector<1x128xf32>
    %c0_20 = arith.constant 0 : index
    %c0_21 = arith.constant 0 : index
    %37 = vector.load %arg7[%c0_20, %c0_21] : memref<1x128xf32, #tpu.memory_space<vmem>>, vector<1x128xf32>
    tpu.vector_store %arg7[%c0_20, %c0_21], %36 {strides = array<i32>} : memref<1x128xf32, #tpu.memory_space<vmem>>, vector<1x128xf32>,
    return
  }
}

</mosaic_0001>

<bundles_post_ra>
// kernel: tpu_custom_call.1
= control target key start
LH: loop header
LB: loop body
LE: loop exit
PB: predicated region body
PF: predicated region fallthrough
CT: control target
= control target key end

     0   :  { %12 = vsyncpa [#allocation3], 0  ;;  %s799_s0 = inlined_call_operand.hbm [shape: f32[1,9], index: 0, kind: input, shape index: {}]   ;;  %s800_s1 = inlined_call_operand.hbm [shape: f32[9,33], index: 1, kind: input, shape index: {}]   ;;  %s801_s2 = inlined_call_operand.hbm [shape: f32[33,128], index: 2, kind: input, shape index: {}]   ;;  %s802_s3 = inlined_call_operand.hbm [shape: f32[32,128], index: 3, kind: input, shape index: {}]   ;;  %s803_s4 = inlined_call_operand.vmem [shape: f32[1,32], index: 4, kind: input, shape index: {}]   ;;  %s804_s5 = inlined_call_operand.hbm [shape: f32[32,128], index: 5, kind: input, shape index: {}]   ;;  %s805_s6 = inlined_call_operand.vmem [shape: f32[1,128], index: 6, kind: input, shape index: {}]   ;;  %s806_s7 = inlined_call_operand.hbm [shape: f32[1,128], index: 7, kind: output, shape index: {}]  }
   0x1   :  { %13 = vsyncpa [#allocation6], 0 }
   0x2   :  { %14 = vsyncpa [#allocation9], 0 }
   0x3   :  { %15 = vsyncpa [#allocation4], 0  ;;  %s681_s24 = smov [#allocation5]  }
   0x4   :  { %s31_s25 = sshll.u32 %s681_s24, 4  ;;  %s32_s25 = int_to_ptr.vmem [resolvable:$true] %s31_s25 }
   0x5   :  { %s561_s26 = scalar_lea.vmem %s32_s25, 256  ;;  %p566_p1 = scmp.lt.s32.totalorder %s32_s25, %s32_s25 }
   0x6   :  { %p562_p0 = scmp.ne.s32.totalorder %s32_s25, %s561_s26  ;;  %p567_p2 = scmp.lt.s32.totalorder %s561_s26, %s561_s26 }
   0x8   :  { %p568_p3 = por %p567_p2, %p566_p1 }
   0xa   :  { %p569_p4 = pnand %p568_p3, %p562_p0 }
   0xc   :  { %572 = shalt.err (!%p569_p4)
}
   0xd   :  { %s682_s27 = smov 128   ;;  %s683_s28 = smov 8  }
   0xe   :  { %37 = dma.hbm_to_vmem [thread:$0]  %s800_s1, 256, %s32_s25, [#allocation6], %s682_s27, %s682_s27, %s683_s28  }
   0xf   :  { %s684_s8 = smov [#allocation8]   ;;  %s685_s10 = smov [#allocation2]  }
  0x10   :  { %s55_s9 = sshll.u32 %s684_s8, 4  ;;  %s22_s11 = sshll.u32 %s685_s10, 4  ;;  %s56_s9 = int_to_ptr.vmem [resolvable:$true] %s55_s9  ;;  %s23_s11 = int_to_ptr.vmem [resolvable:$true] %s22_s11 }
  0x11   :  { %s581_s12 = scalar_lea.vmem %s56_s9, 512  ;;  %p586_p6 = scmp.lt.s32.totalorder %s56_s9, %s56_s9 }
  0x12   :  { %p582_p5 = scmp.ne.s32.totalorder %s56_s9, %s581_s12  ;;  %p587_p7 = scmp.lt.s32.totalorder %s581_s12, %s581_s12 }
  0x14   :  { %p588_p8 = por %p587_p7, %p586_p6 }
  0x16   :  { %p589_p9 = pnand %p588_p8, %p582_p5 }
  0x18   :  { %592 = shalt.err (!%p589_p9)
}
  0x19   :  { %61 = dma.hbm_to_vmem [thread:$0]  %s802_s3, 512, %s56_s9, [#allocation9], %s682_s27, %s682_s27, %s683_s28  }
  0x1a   :  { %s601_s1 = scalar_lea.vmem %s23_s11, 16  ;;  %s605_s15 = scalar_lea.vmem %s23_s11, 32 }
  0x1b   :  { %p602_p10 = scmp.ne.s32.totalorder %s23_s11, %s601_s1  ;;  %p606_p11 = scmp.lt.s32.totalorder %s23_s11, %s23_s11 }
  0x1c   :  { %p607_p12 = scmp.lt.s32.totalorder %s605_s15, %s601_s1 }
  0x1e   :  { %p608_p13 = por %p607_p12, %p606_p11 }
  0x20   :  { %p609_p0 = pnand %p608_p13, %p602_p10 }
  0x22   :  { %612 = shalt.err (!%p609_p0)
}
  0x23   :  { %25 = dma.hbm_to_vmem [thread:$0]  %s799_s0, 16, %s23_s11, [#allocation3]  }
  0x24   :  { %s686_s18 = smov [#allocation7]   ;;  %s687_s20 = smov [#allocation10]  }
  0x25   :  { %s43_s19 = sshll.u32 %s686_s18, 4  ;;  %s69_s21 = sshll.u32 %s687_s20, 4  ;;  %s44_s19 = int_to_ptr.vmem [resolvable:$true] %s43_s19  ;;  %s70_s21 = int_to_ptr.vmem [resolvable:$true] %s69_s21 }
  0x26   :  { %s621_s22 = scalar_lea.vmem %s44_s19, 640  ;;  %p626_p2 = scmp.lt.s32.totalorder %s44_s19, %s44_s19 }
  0x27   :  { %p622_p1 = scmp.ne.s32.totalorder %s44_s19, %s621_s22  ;;  %p627_p3 = scmp.lt.s32.totalorder %s621_s22, %s621_s22 }
  0x29   :  { %p628_p4 = por %p627_p3, %p626_p2 }
  0x2b   :  { %p629_p5 = pnand %p628_p4, %p622_p1 }
  0x2d   :  { %632 = shalt.err (!%p629_p5)
}
  0x2e   :  { %49 = dma.hbm_to_vmem [thread:$0]  %s801_s2, 640, %s44_s19, [#allocation6], %s682_s27, %s682_s27, %s683_s28  }
  0x2f   :  { %s641_s0 = scalar_lea.vmem %s70_s21, 512  ;;  %p646_p7 = scmp.lt.s32.totalorder %s70_s21, %s70_s21 }
  0x30   :  { %p642_p6 = scmp.ne.s32.totalorder %s70_s21, %s641_s0  ;;  %p647_p8 = scmp.lt.s32.totalorder %s641_s0, %s641_s0 }
  0x32   :  { %p648_p9 = por %p647_p8, %p646_p7 }
  0x34   :  { %p649_p10 = pnand %p648_p9, %p642_p6 }
  0x36   :  { %652 = shalt.err (!%p649_p10)
}
  0x37   :  { %75 = dma.hbm_to_vmem [thread:$0]  %s804_s5, 512, %s70_s21, [#allocation9], %s682_s27, %s682_s27, %s683_s28  }
  0x38   :  { %673 = dma.done.wait [#allocation3], 16  }
  0x39   :  { %674 = vsyncadd [#allocation3], 4294967280 }
  0x3a   :  { %675 = dma.done.wait [#allocation6], 896  }
  0x3b   :  { %676 = vsyncadd [#allocation6], 4294966400 }
  0x3c   :  { %677 = dma.done.wait [#allocation9], 1024  }
  0x3d   :  { %678 = vsyncadd [#allocation9], 4294966272  ;;  %v688_v0 = vmov 0.0   ;;  %vm689_vm0 = vmmov 0   ;;  %vm100_vm1 = vcmask 1040384   ;;  %v94_v2 = vld [vmem:[#allocation5] sm:$0xff]  ;;  %v359_v30 = vlaneseq }
  0x3e   :  { %492 = vmatprep.subr.mxu0 %v688_v0  ;;  %496 = vmatprep.mubr.msk.f32.mxu0 %vm689_vm0, %v688_v0  ;;  %v95_v1 = vld [vmem:[#allocation5 + $0x8] sm:$0x1]  ;;  %v93_v3 = vld [vmem:[#allocation2] sm:$0x1]  ;;  %vm96_vm2 = vcmask 72704   ;;  %v184_v4 = vld [vmem:[#allocation8 + $0x18] sm:$0xff] }
  0x3f   :  { %499 = vmatprep.subr.mxu1 %v688_v0  ;;  %507 = vmatprep.mubr.msk.f32.mxu1 %vm689_vm0, %v688_v0  ;;  %v180_v5 = vld [vmem:[#allocation7 + $0x20] sm:$0x1]  ;;  %v183_v6 = vld [vmem:[#allocation8 + $0x10] sm:$0xff]  ;;  %v182_v8 = vld [vmem:[#allocation8 + $0x8] sm:$0xff]  ;;  %vm185_vm3 = vcmask 261120   ;;  %vm259_vm4 = vcmask 269312  }
  0x40   :  { %493 = vmatpush3.msk.msra.mxu0 %vm100_vm1, %v95_v1  ;;  %500 = vmatpush3.msra.mxu1 %v184_v4  ;;  %v179_v7 = vld [vmem:[#allocation7 + $0x18] sm:$0xff]  ;;  %v178_v9 = vld [vmem:[#allocation7 + $0x10] sm:$0xff]  ;;  %v181_v10 = vld [vmem:[#allocation8] sm:$0xff]  ;;  %s691_s26 = smov 64   ;;  %v360_v31 = vshrl.u32 %v359_v30, 7  ;;  %s692_s27 = smov 96  }
  0x41   :  { %494 = vmatprep.subr.mxu0 %v688_v0  ;;  %501 = vmatprep.subr.mxu1 %v688_v0  ;;  %v177_v11 = vld [vmem:[#allocation7 + $0x8] sm:$0xff]  ;;  %v176_v13 = vld [vmem:[#allocation7] sm:$0xff]  ;;  %v370_v33 = vld [vmem:[#allocation10 + $0x10] sm:$0xff]  ;;  %s693_s30 = smov [#allocation11]  }
  0x42   :  { %495 = vmatpush3.msra.mxu0 %v94_v2  ;;  %502 = vmatpush3.msra.mxu1 %v183_v6  ;;  %v175_v12 = vld [vmem:[%s803_s4] sm:$0x1]  ;;  %s690_s4 = smov 32   ;;  %v371_v32 = vld [vmem:[#allocation10 + $0x18] sm:$0xff]  ;;  %v361_v34 = vsub.s32 0, %v360_v31  ;;  %v369_v35 = vld [vmem:[#allocation10 + $0x8] sm:$0xff] }
  0x43   :  { %497 = vmatmul.mubr.msk.f32.vlgmr.msra.gmra.mxu0 %vm96_vm2, %v93_v3  ;;  %510 = vmatprep.subr.mxu0 %v688_v0  ;;  %v368_v37 = vld [vmem:[#allocation10] sm:$0xff]  ;;  %s455_s8 = sshll.u32 %s693_s30, 4  ;;  %s456_s8 = int_to_ptr.vmem [resolvable:$true] %s455_s8 }
  0x44   :  { %511 = vmatpush3.msk.msra.mxu0 %vm100_vm1, %v180_v5  ;;  %503 = vmatprep.subr.mxu1 %v688_v0  ;;  %v362_v38 = vrot.slane %v175_v12, %v361_v34  ;;  %v372_v46 = vld [vmem:[%s805_s6] sm:$0x1]  ;;  %s653_s9 = scalar_lea.vmem %s456_s8, 16  ;;  %s657_s10 = scalar_lea.vmem %s456_s8, 32 }
  0x45   :  { %512 = vmatprep.subr.mxu0 %v688_v0  ;;  %504 = vmatpush3.msra.mxu1 %v182_v8  ;;  %p654_p11 = scmp.ne.s32.totalorder %s456_s8, %s653_s9  ;;  %p658_p12 = scmp.lt.s32.totalorder %s456_s8, %s456_s8 }
  0x46   :  { %513 = vmatpush3.msra.mxu0 %v179_v7  ;;  %505 = vmatprep.subr.mxu1 %v688_v0  ;;  %p659_p13 = scmp.lt.s32.totalorder %s657_s10, %s653_s9 }
  0x47   :  { %514 = vmatprep.subr.mxu0 %v688_v0  ;;  %520 = vmatprep.mubr.msk.f32.mxu0 %vm689_vm0, %v688_v0 }
  0x48   :  { %515 = vmatpush3.msra.mxu0 %v178_v9  ;;  %506 = vmatpush3.msra.mxu1 %v181_v10  ;;  %p660_p0 = por %p659_p13, %p658_p12 }
  0x49   :  { %516 = vmatprep.subr.mxu0 %v688_v0  ;;  %508 = vmatmul.mubr.msk.f32.vlgmr.msra.gmra.mxu1 %vm185_vm3, %v175_v12 }
  0x4a   :  { %517 = vmatpush3.msra.mxu0 %v177_v11  ;;  %523 = vmatprep.subr.mxu1 %v688_v0  ;;  %p661_p1 = pnand %p660_p0, %p654_p11 }
  0x4b   :  { %518 = vmatprep.subr.mxu0 %v688_v0  ;;  %531 = vmatprep.mubr.msk.f32.mxu1 %vm689_vm0, %v688_v0 }
  0x4c   :  { %519 = vmatpush3.msra.mxu0 %v176_v13  ;;  %524 = vmatpush3.msra.mxu1 %v371_v32 }
  0x4d   :  { %525 = vmatprep.subr.mxu1 %v688_v0 }
  0x4e   :  { %526 = vmatpush3.msra.mxu1 %v370_v33 }
  0x4f   :  { %527 = vmatprep.subr.mxu1 %v688_v0 }
  0x50   :  { %528 = vmatpush3.msra.mxu1 %v369_v35 }
  0x51   :  { %529 = vmatprep.subr.mxu1 %v688_v0 }
  0x52   :  { %530 = vmatpush3.msra.mxu1 %v368_v37 }
 0x103   :  { %v170_v14 = vpop.f32.mrf.mxu0 }
 0x104   :  { %v174_v15 = vmax.f32 %v170_v14, 0.0 }
 0x105   :  { %v498_v16 = vpop.f32.mrf.mxu0 }
 0x106   :  { %521 = vmatmul.mubr.msk.f32.vlgmr.msra.gmra.mxu0 %vm259_vm4, %v174_v15 }
 0x109   :  { %v255_v17 = vpop.f32.mrf.mxu1 }
 0x10b   :  { %v509_v18 = vpop.f32.mrf.mxu1 }
 0x1c6   :  { %v332_v19 = vpop.f32.mrf.mxu0 }
 0x1c7   :  { %v333_v20 = vadd.f32 %v332_v19, %v255_v17 }
 0x1c8   :  { %v522_v21 = vpop.f32.mrf.mxu0 }
 0x1c9   :  { %343 = vrot.lane.b32.xlu0 %v333_v20, %s690_s4  ;;  %v471_v22 = vmul.f32 -1.442695, %v333_v20 }
 0x1cb   :  { %547 = vpow2.f32 %v471_v22 }
 0x1d8   :  { %v548_v23 = vpop.eup %547 }
 0x1d9   :  { %v339_v24 = vadd.f32 1.0, %v548_v23 }
 0x1db   :  { %549 = vrcp.f32 %v339_v24 }
 0x1e8   :  { %v550_v25 = vpop.eup %549 }
 0x1e9   :  { %v353_v40 = vsub.f32 1.0, %v550_v25 }
 0x23b   :  { %v344_v26 = vpop.permute.xlu0 %343 }
 0x23c   :  { %v346_v27 = vmul.f32 %v550_v25, %v344_v26 }
 0x23e   :  { %348 = vrot.lane.b32.xlu0 %v346_v27, %s691_s26 }
 0x2b0   :  { %v349_v28 = vpop.permute.xlu0 %348 }
 0x2b1   :  { %v351_v29 = vadd.f32 %v349_v28, %v333_v20 }
 0x2b3   :  { %551 = vtanh.f32 %v351_v29 }
 0x2c0   :  { %v552_v36 = vpop.eup %551 }
 0x2c1   :  { %355 = vrot.lane.b32.xlu1 %v552_v36, %s692_s27 }
 0x2c5   :  { %363 = vrot.lane.b32.xlu1 %v362_v38, %s690_s4 }
 0x333   :  { %v356_v39 = vpop.permute.xlu1 %355 }
 0x334   :  { %v358_v42 = vmul.f32 %v356_v39, %v353_v40 }
 0x337   :  { %v364_v41 = vpop.permute.xlu1 %363 }
 0x338   :  { %v366_v43 = vmul.f32 %v550_v25, %v364_v41 }
 0x33a   :  { %v367_v44 = vadd.f32 %v366_v43, %v358_v42 }
 0x33c   :  { %374 = vrot.lane.b32.xlu0 %v367_v44, %s692_s27 }
 0x3ae   :  { %v375_v45 = vpop.permute.xlu0 %374 }
 0x3af   :  { %532 = vmatmul.mubr.msk.f32.vlgmr.msra.gmra.mxu1 %vm185_vm3, %v375_v45 }
 0x46f   :  { %v444_v47 = vpop.f32.mrf.mxu1 }
 0x470   :  { %v445_v48 = vadd.f32 %v444_v47, %v372_v46 }
 0x471   :  { %v533_v49 = vpop.f32.mrf.mxu1 }
 0x472   :  { %448 = vst [vmem:[#allocation11] sm:$0x1] %v445_v48 }
 0x473   :  { %664 = shalt.err (!%p661_p1)
}
 0x474   :  { %458 = dma.vmem_to_hbm [thread:$0]  %s456_s8, 16, %s806_s7, [#allocation4]  }
 0x475   :  { %679 = dma.done.wait [#allocation4], 16  }
 0x476   :  { %680 = vsyncadd [#allocation4], 4294967280 }
 0x477   :  { %462 = vsyncpa [#allocation3], 1 }
 0x478   :  { %463 = vsyncpa [#allocation6], 1 }
 0x479   :  { %464 = vsyncpa [#allocation9], 1 }
 0x47a   :  { %465 = vsyncpa [#allocation4], 1 }

</bundles_post_ra>
